<compile_context>
chip_gen: v6e
topology: v6e:2x2x1
jax: 0.10.0
libtpu: 0.0.40
codegen_flags: <defaults>
</compile_context>

<pallas_src>
import functools

import jax
import jax.numpy as jnp
from jax import lax
from jax.experimental import pallas as pl
from jax.experimental.pallas import tpu as pltpu


def _round_up(n, m):
    return ((n + m - 1) // m) * m


# ----------------------------------------------------------------------------
# Kernel
# ----------------------------------------------------------------------------
def _kronenet_kernel(xa_ref, xb_ref, w1a_ref, w1b_ref, b1_ref,
                     w2_ref, b2_ref, w3_ref, b3_ref, o_ref,
                     *, use_sigmoid, n_b):
    """Fused KroneNet forward for one batch tile.

    xa_ref/xb_ref : (TB, 2)  f32   the two Kronecker input factors
    w1a/w1b       : (2, N1)  f32   fc1 factor weights mapped to disjoint lane blocks
    w2            : (N1, N2) f32   fc2 block-diagonal fused weight
    w3            : (N2, 8)  f32   fc3: a-logit -> col 0, b-logits -> cols [1, 1+n_b)
    o_ref         : (TB, 8)  f32   softmax probabilities in columns [1, 1+n_b)
    """
    f32 = jnp.float32
    if use_sigmoid:
        act = jax.nn.sigmoid
    else:
        act = lambda v: jnp.maximum(v, 0.0)

    xa = xa_ref[...]
    xb = xb_ref[...]
    w1a = w1a_ref[...]
    w1b = w1b_ref[...]

    # fc1: only 2 input features per factor -> VPU broadcast-MACs (no tiny-K matmul).
    h = (xa[:, 0:1] * w1a[0:1, :] + xa[:, 1:2] * w1a[1:2, :]
         + xb[:, 0:1] * w1b[0:1, :] + xb[:, 1:2] * w1b[1:2, :]
         + b1_ref[...])
    h = act(h)                                                           # (TB, N1)

    # fc2 / fc3 on the MXU, f32 accumulate.
    h = act(jnp.dot(h, w2_ref[...], preferred_element_type=f32) + b2_ref[...])   # (TB, N2)
    h = jnp.dot(h, w3_ref[...], preferred_element_type=f32) + b3_ref[...]        # (TB, 8)

    # KroneSoftmax(1, n_b): outer product of the single a-logit with the b-logits,
    # then a masked softmax over the n_b real lanes (all on 8 lanes only).
    a = h[:, 0:1]                                                        # (TB, 1)
    logits = a * h                                                       # (TB, 8)
    col = lax.broadcasted_iota(jnp.int32, logits.shape, 1)
    valid = (col >= 1) & (col < 1 + n_b)
    masked = jnp.where(valid, logits, -1e30)
    m = jnp.max(masked, axis=-1, keepdims=True)
    e = jnp.where(valid, jnp.exp(masked - m), 0.0)
    s = jnp.sum(e, axis=-1, keepdims=True)
    r = pl.reciprocal(s, approx=True)          # EUP reciprocal
    r = r * (2.0 - s * r)                      # one Newton step -> f32 accuracy
    o_ref[...] = e * r


# ----------------------------------------------------------------------------
# One-time parameter packing (do NOT call per forward pass)
# ----------------------------------------------------------------------------
def pack_params(params):
    """Fuse the 12 KroneNet parameters into fused/padded f32 weights + biases.

    Returns (packed_params, n_b) where
      packed = (W1a (2,N1), W1b (2,N1), B1 (1,N1), W2 (N1,N2), B2 (1,N2),
                W3 (N2,8), B3 (1,8)),
    all (in, out)-oriented, block-diagonal over the a/b lane blocks.
    """
    f32 = jnp.float32
    (w1a, b1a, w1b, b1b,
     w2a, b2a, w2b, b2b,
     w3a, b3a, w3b, b3b) = [jnp.asarray(p, f32) for p in params]

    oa1, ob1 = w1a.shape[0], w1b.shape[0]
    oa2, ob2 = w2a.shape[0], w2b.shape[0]
    oa3, ob3 = w3a.shape[0], w3b.shape[0]
    assert oa3 == 1, "KroneSoftmax(1, n) layout requires fc3 out_features_a == 1"

    n1 = _round_up(oa1 + ob1, 8)
    n2 = _round_up(oa2 + ob2, 8)
    out_lanes = _round_up(1 + ob3, 8)          # 8 for n_b == 3

    # fc1: a-features feed lanes [0, oa1), b-features feed lanes [oa1, oa1+ob1).
    W1a = jnp.zeros((2, n1), f32).at[:, 0:oa1].set(w1a.T)
    W1b = jnp.zeros((2, n1), f32).at[:, oa1:oa1 + ob1].set(w1b.T)
    B1 = jnp.zeros((1, n1), f32).at[0, 0:oa1].set(b1a).at[0, oa1:oa1 + ob1].set(b1b)

    # fc2: block-diagonal over the a / b lane blocks.
    W2 = (jnp.zeros((n1, n2), f32)
          .at[0:oa1, 0:oa2].set(w2a.T)
          .at[oa1:oa1 + ob1, oa2:oa2 + ob2].set(w2b.T))
    B2 = jnp.zeros((1, n2), f32).at[0, 0:oa2].set(b2a).at[0, oa2:oa2 + ob2].set(b2b)

    # fc3: a-logit -> column 0, b-logits -> columns [1, 1+ob3); only 8 lanes total.
    W3 = (jnp.zeros((n2, out_lanes), f32)
          .at[0:oa2, 0:1].set(w3a.T)
          .at[oa2:oa2 + ob2, 1:1 + ob3].set(w3b.T))
    B3 = jnp.zeros((1, out_lanes), f32).at[0, 0:1].set(b3a).at[0, 1:1 + ob3].set(b3b)

    return (W1a, W1b, B1, W2, B2, W3, B3), ob3


# ----------------------------------------------------------------------------
# Forward wrapper
# ----------------------------------------------------------------------------
def kronenet_forward(x, packed, *, n_b=3, use_sigmoid=False, tb_target=8192):
    """x: (2, B, F) with F >= 2 (only the first 2 features are used, as in PyTorch)."""
    W1a, W1b, B1, W2, B2, W3, B3 = packed
    B = x.shape[1]
    n1, n2 = W2.shape
    out_lanes = W3.shape[1]
    assert 1 + n_b <= out_lanes

    # The two Kronecker factors are passed as two tiny (B_pad, 2) operands —
    # no fused/padded xf slab is materialized in HBM.
    xa = x[0, :, :2].astype(jnp.float32)
    xb = x[1, :, :2].astype(jnp.float32)

    # Batch tiling: big TB to amortize the ~0.35 us/step pipeline overhead, but
    # capped at ceil(B/2) (rounded to a sublane multiple) so the grid has >= 2
    # steps whenever the batch is non-trivial (both v7x TensorCores get work).
    half = _round_up(max(1, -(-B // 2)), 8)
    TB = max(8, min(tb_target, half))
    B_pad = _round_up(B, TB)
    if B_pad != B:
        xa = jnp.pad(xa, ((0, B_pad - B), (0, 0)))
        xb = jnp.pad(xb, ((0, B_pad - B), (0, 0)))

    def resident(arr):  # weights/biases stay in VMEM across all batch tiles
        return pl.BlockSpec(arr.shape, lambda i: (0, 0))

    kernel = functools.partial(_kronenet_kernel,
                               use_sigmoid=use_sigmoid, n_b=n_b)

    weight_bytes = sum(int(p.size) * p.dtype.itemsize for p in packed)
    cost = pl.CostEstimate(
        flops=2 * B_pad * (2 * n1 + 2 * n1 + n1 * n2 + n2 * out_lanes),
        transcendentals=B_pad * out_lanes,
        bytes_accessed=B_pad * (2 + 2 + out_lanes) * 4 + weight_bytes,
    )

    out = pl.pallas_call(
        kernel,
        out_shape=jax.ShapeDtypeStruct((B_pad, out_lanes), jnp.float32),
        grid=(B_pad // TB,),
        in_specs=[pl.BlockSpec((TB, 2), lambda i: (i, 0)),
                  pl.BlockSpec((TB, 2), lambda i: (i, 0)),
                  resident(W1a), resident(W1b), resident(B1),
                  resident(W2), resident(B2),
                  resident(W3), resident(B3)],
        out_specs=pl.BlockSpec((TB, out_lanes), lambda i: (i, 0)),
        compiler_params=pltpu.CompilerParams(
            dimension_semantics=("parallel",),
            vmem_limit_bytes=32 << 20),
        cost_estimate=cost,
    )(xa, xb, W1a, W1b, B1, W2, B2, W3, B3)

    # Softmax probabilities occupy columns [1, 1+n_b) of the 8-lane output.
    return out[:B, 1:1 + n_b]


# ----------------------------------------------------------------------------
# Pure-JAX reference (mirrors the PyTorch forward exactly, f32 throughout)
# ----------------------------------------------------------------------------
def kronenet_reference(x, params, *, use_sigmoid=False):
    act = jax.nn.sigmoid if use_sigmoid else jax.nn.relu
    (w1a, b1a, w1b, b1b,
     w2a, b2a, w2b, b2b,
     w3a, b3a, w3b, b3b) = [jnp.asarray(p, jnp.float32) for p in params]

    x_a = x[0][:, :2].astype(jnp.float32)
    x_b = x[1][:, :2].astype(jnp.float32)
    # KroneLinear's zero-padding is sliced away by the next layer, so carrying
    # the two factors separately is exactly equivalent.
    h_a = act(x_a @ w1a.T + b1a)
    h_b = act(x_b @ w1b.T + b1b)
    h_a = act(h_a @ w2a.T + b2a)
    h_b = act(h_b @ w2b.T + b2b)
    h_a = h_a @ w3a.T + b3a          # (B, 1)
    h_b = h_b @ w3b.T + b3b          # (B, 3)
    y = (h_a[:, :, None, None] * h_b[:, None, :, None]).reshape(x.shape[1], -1)
    return jax.nn.softmax(y, axis=1)


def make_params(key, middle_a=(8, 16), middle_b=(16, 8)):
    """Deterministic init (the PyTorch module never initializes its params,
    so any deterministic choice is acceptable for this synthetic kernel)."""
    shapes = [
        (middle_a[0], 2), (middle_a[0],), (middle_b[0], 2), (middle_b[0],),   # fc1
        (middle_a[1], middle_a[0]), (middle_a[1],),
        (middle_b[1], middle_b[0]), (middle_b[1],),                            # fc2
        (1, middle_a[1]), (1,), (3, middle_b[1]), (3,),                        # fc3
    ]
    keys = jax.random.split(key, len(shapes))
    return [0.5 * jax.random.normal(k, s, jnp.float32) for k, s in zip(keys, shapes)]


if __name__ == "__main__":
    key = jax.random.PRNGKey(0)
    k_x, k_x2, k_p = jax.random.split(key, 3)

    middle_layer_a = (8, 16)
    middle_layer_b = (16, 8)
    params = make_params(k_p, middle_layer_a, middle_layer_b)

    # Pack / pad / fuse parameters ONCE (cached across calls).
    packed, n_b = pack_params(params)
    fwd = jax.jit(functools.partial(kronenet_forward, n_b=n_b, use_sigmoid=False))

    # Small check (single grid step).
    batch = 8
    x = jax.random.normal(k_x, (2, batch, 2), jnp.float32)   # (factors, batch, feat)
    y = jax.block_until_ready(fwd(x, packed))
    y_ref = kronenet_reference(x, params, use_sigmoid=False)
    assert y.shape == (batch, 3), y.shape
    assert jnp.allclose(y, y_ref, atol=1e-5, rtol=1e-5), (y, y_ref)
    assert jnp.allclose(jnp.sum(y, axis=1), 1.0, atol=1e-5)

    # Second check exercising batch padding and a multi-step (>=2) grid.
    batch2 = 300
    x2 = jax.random.normal(k_x2, (2, batch2, 2), jnp.float32)
    y2 = jax.block_until_ready(fwd(x2, packed))
    y2_ref = kronenet_reference(x2, params, use_sigmoid=False)
    assert y2.shape == (batch2, 3), y2.shape
    assert jnp.allclose(y2, y2_ref, atol=1e-5, rtol=1e-5)
    assert jnp.allclose(jnp.sum(y2, axis=1), 1.0, atol=1e-5)

    print("KERNEL_OK")
</pallas_src>

<mosaic_0001>
module attributes {stable_mosaic.version = 11 : i64} {
  func.func @_kronenet_kernel(%arg0: i32, %arg1: memref<8x2xf32, #tpu.memory_space<vmem>>, %arg2: memref<8x2xf32, #tpu.memory_space<vmem>>, %arg3: memref<2x24xf32, #tpu.memory_space<vmem>>, %arg4: memref<2x24xf32, #tpu.memory_space<vmem>>, %arg5: memref<1x24xf32, #tpu.memory_space<vmem>>, %arg6: memref<24x24xf32, #tpu.memory_space<vmem>>, %arg7: memref<1x24xf32, #tpu.memory_space<vmem>>, %arg8: memref<24x8xf32, #tpu.memory_space<vmem>>, %arg9: memref<1x8xf32, #tpu.memory_space<vmem>>, %arg10: memref<8x8xf32, #tpu.memory_space<vmem>>) attributes {dimension_semantics = [#tpu.dimension_semantics<parallel>], iteration_bounds = array<i64: 1>, scalar_prefetch = 0 : i64, scratch_operands = 0 : i64, tpu.core_type = #tpu.core_type<tc>, window_params = [{transform_indices = @transform_0, window_bounds = array<i64: 8, 2>}, {transform_indices = @transform_1, window_bounds = array<i64: 8, 2>}, {pipeline_mode = #tpu.pipeline_mode<synchronous>, transform_indices = @transform_2, window_bounds = array<i64: 2, 24>}, {pipeline_mode = #tpu.pipeline_mode<synchronous>, transform_indices = @transform_3, window_bounds = array<i64: 2, 24>}, {pipeline_mode = #tpu.pipeline_mode<synchronous>, transform_indices = @transform_4, window_bounds = array<i64: 1, 24>}, {pipeline_mode = #tpu.pipeline_mode<synchronous>, transform_indices = @transform_5, window_bounds = array<i64: 24, 24>}, {pipeline_mode = #tpu.pipeline_mode<synchronous>, transform_indices = @transform_6, window_bounds = array<i64: 1, 24>}, {pipeline_mode = #tpu.pipeline_mode<synchronous>, transform_indices = @transform_7, window_bounds = array<i64: 24, 8>}, {pipeline_mode = #tpu.pipeline_mode<synchronous>, transform_indices = @transform_8, window_bounds = array<i64: 1, 8>}, {transform_indices = @transform_9, window_bounds = array<i64: 8, 8>}]} {
    %c0 = arith.constant 0 : index
    %c0_0 = arith.constant 0 : index
    %0 = vector.load %arg1[%c0, %c0_0] : memref<8x2xf32, #tpu.memory_space<vmem>>, vector<8x2xf32>
    %c0_1 = arith.constant 0 : index
    %c0_2 = arith.constant 0 : index
    %1 = vector.load %arg2[%c0_1, %c0_2] : memref<8x2xf32, #tpu.memory_space<vmem>>, vector<8x2xf32>
    %c0_3 = arith.constant 0 : index
    %c0_4 = arith.constant 0 : index
    %2 = vector.load %arg3[%c0_3, %c0_4] : memref<2x24xf32, #tpu.memory_space<vmem>>, vector<2x24xf32>
    %c0_5 = arith.constant 0 : index
    %c0_6 = arith.constant 0 : index
    %3 = vector.load %arg4[%c0_5, %c0_6] : memref<2x24xf32, #tpu.memory_space<vmem>>, vector<2x24xf32>
    %4 = vector.extract_strided_slice %0 {offsets = [0, 0], sizes = [8, 1], strides = [1, 1]} : vector<8x2xf32> to vector<8x1xf32>
    %5 = vector.extract_strided_slice %2 {offsets = [0, 0], sizes = [1, 24], strides = [1, 1]} : vector<2x24xf32> to vector<1x24xf32>
    %6 = vector.broadcast %4 : vector<8x1xf32> to vector<8x24xf32>
    %7 = vector.broadcast %5 : vector<1x24xf32> to vector<8x24xf32>
    %8 = arith.mulf %6, %7 : vector<8x24xf32>
    %9 = vector.extract_strided_slice %0 {offsets = [0, 1], sizes = [8, 1], strides = [1, 1]} : vector<8x2xf32> to vector<8x1xf32>
    %10 = vector.extract_strided_slice %2 {offsets = [1, 0], sizes = [1, 24], strides = [1, 1]} : vector<2x24xf32> to vector<1x24xf32>
    %11 = vector.broadcast %9 : vector<8x1xf32> to vector<8x24xf32>
    %12 = vector.broadcast %10 : vector<1x24xf32> to vector<8x24xf32>
    %13 = arith.mulf %11, %12 : vector<8x24xf32>
    %14 = arith.addf %8, %13 : vector<8x24xf32>
    %15 = vector.extract_strided_slice %1 {offsets = [0, 0], sizes = [8, 1], strides = [1, 1]} : vector<8x2xf32> to vector<8x1xf32>
    %16 = vector.extract_strided_slice %3 {offsets = [0, 0], sizes = [1, 24], strides = [1, 1]} : vector<2x24xf32> to vector<1x24xf32>
    %17 = vector.broadcast %15 : vector<8x1xf32> to vector<8x24xf32>
    %18 = vector.broadcast %16 : vector<1x24xf32> to vector<8x24xf32>
    %19 = arith.mulf %17, %18 : vector<8x24xf32>
    %20 = arith.addf %14, %19 : vector<8x24xf32>
    %21 = vector.extract_strided_slice %1 {offsets = [0, 1], sizes = [8, 1], strides = [1, 1]} : vector<8x2xf32> to vector<8x1xf32>
    %22 = vector.extract_strided_slice %3 {offsets = [1, 0], sizes = [1, 24], strides = [1, 1]} : vector<2x24xf32> to vector<1x24xf32>
    %23 = vector.broadcast %21 : vector<8x1xf32> to vector<8x24xf32>
    %24 = vector.broadcast %22 : vector<1x24xf32> to vector<8x24xf32>
    %25 = arith.mulf %23, %24 : vector<8x24xf32>
    %26 = arith.addf %20, %25 : vector<8x24xf32>
    %c0_7 = arith.constant 0 : index
    %c0_8 = arith.constant 0 : index
    %27 = vector.load %arg5[%c0_7, %c0_8] : memref<1x24xf32, #tpu.memory_space<vmem>>, vector<1x24xf32>
    %28 = vector.broadcast %27 : vector<1x24xf32> to vector<8x24xf32>
    %29 = arith.addf %26, %28 : vector<8x24xf32>
    %cst = arith.constant 0.000000e+00 : f32
    %30 = vector.broadcast %cst : f32 to vector<8x24xf32>
    %31 = arith.maximumf %29, %30 : vector<8x24xf32>
    %c0_9 = arith.constant 0 : index
    %c0_10 = arith.constant 0 : index
    %32 = vector.load %arg6[%c0_9, %c0_10] : memref<24x24xf32, #tpu.memory_space<vmem>>, vector<24x24xf32>
    %cst_11 = arith.constant dense<0.000000e+00> : vector<8x24xf32>
    %33 = tpu.matmul %31, %32, %cst_11 {dimension_numbers = #tpu.dot_dimension_numbers<[1], [0], [0], [1], [0, 0, 1, 1], [], []>} : vector<8x24xf32>, vector<24x24xf32>, vector<8x24xf32> -> vector<8x24xf32>
    %c0_12 = arith.constant 0 : index
    %c0_13 = arith.constant 0 : index
    %34 = vector.load %arg7[%c0_12, %c0_13] : memref<1x24xf32, #tpu.memory_space<vmem>>, vector<1x24xf32>
    %35 = vector.broadcast %34 : vector<1x24xf32> to vector<8x24xf32>
    %36 = arith.addf %33, %35 : vector<8x24xf32>
    %cst_14 = arith.constant 0.000000e+00 : f32
    %37 = vector.broadcast %cst_14 : f32 to vector<8x24xf32>
    %38 = arith.maximumf %36, %37 : vector<8x24xf32>
    %c0_15 = arith.constant 0 : index
    %c0_16 = arith.constant 0 : index
    %39 = vector.load %arg8[%c0_15, %c0_16] : memref<24x8xf32, #tpu.memory_space<vmem>>, vector<24x8xf32>
    %cst_17 = arith.constant dense<0.000000e+00> : vector<8x8xf32>
    %40 = tpu.matmul %38, %39, %cst_17 {dimension_numbers = #tpu.dot_dimension_numbers<[1], [0], [0], [1], [0, 0, 1, 1], [], []>} : vector<8x24xf32>, vector<24x8xf32>, vector<8x8xf32> -> vector<8x8xf32>
    %c0_18 = arith.constant 0 : index
    %c0_19 = arith.constant 0 : index
    %41 = vector.load %arg9[%c0_18, %c0_19] : memref<1x8xf32, #tpu.memory_space<vmem>>, vector<1x8xf32>
    %42 = vector.broadcast %41 : vector<1x8xf32> to vector<8x8xf32>
    %43 = arith.addf %40, %42 : vector<8x8xf32>
    %44 = vector.extract_strided_slice %43 {offsets = [0, 0], sizes = [8, 1], strides = [1, 1]} : vector<8x8xf32> to vector<8x1xf32>
    %45 = vector.broadcast %44 : vector<8x1xf32> to vector<8x8xf32>
    %46 = arith.mulf %45, %43 : vector<8x8xf32>
    %47 = tpu.iota {dimensions = array<i32: 1>} : vector<8x8xi32>
    %c1_i32 = arith.constant 1 : i32
    %48 = vector.broadcast %c1_i32 : i32 to vector<8x8xi32>
    %49 = arith.cmpi sge, %47, %48 : vector<8x8xi32>
    %c4_i32 = arith.constant 4 : i32
    %50 = vector.broadcast %c4_i32 : i32 to vector<8x8xi32>
    %51 = arith.cmpi slt, %47, %50 : vector<8x8xi32>
    %52 = arith.andi %49, %51 : vector<8x8xi1>
    %cst_20 = arith.constant -1.000000e+30 : f32
    %53 = vector.broadcast %cst_20 : f32 to vector<8x8xf32>
    %54 = arith.select %52, %46, %53 : vector<8x8xi1>, vector<8x8xf32>
    %cst_21 = arith.constant dense<0xFF800000> : vector<8xf32>
    %55 = vector.multi_reduction <maximumf>, %54, %cst_21 [1] : vector<8x8xf32> to vector<8xf32>
    %56 = vector.shape_cast %55 : vector<8xf32> to vector<8x1xf32>
    %57 = vector.broadcast %56 : vector<8x1xf32> to vector<8x8xf32>
    %58 = arith.subf %54, %57 : vector<8x8xf32>
    %59 = math.exp %58 : vector<8x8xf32>
    %cst_22 = arith.constant 0.000000e+00 : f32
    %60 = vector.broadcast %cst_22 : f32 to vector<8x8xf32>
    %61 = arith.select %52, %59, %60 : vector<8x8xi1>, vector<8x8xf32>
    %cst_23 = arith.constant dense<0.000000e+00> : vector<8xf32>
    %62 = vector.multi_reduction <add>, %61, %cst_23 [1] : vector<8x8xf32> to vector<8xf32>
    %63 = vector.shape_cast %62 : vector<8xf32> to vector<8x1xf32>
    %64 = tpu.reciprocal %63 {approx = true} : vector<8x1xf32> -> vector<8x1xf32>
    %65 = arith.mulf %63, %64 : vector<8x1xf32>
    %cst_24 = arith.constant 2.000000e+00 : f32
    %66 = vector.broadcast %cst_24 : f32 to vector<8x1xf32>
    %67 = arith.subf %66, %65 : vector<8x1xf32>
    %68 = arith.mulf %64, %67 : vector<8x1xf32>
    %69 = vector.broadcast %68 : vector<8x1xf32> to vector<8x8xf32>
    %70 = arith.mulf %61, %69 : vector<8x8xf32>
    %c0_25 = arith.constant 0 : index
    %c0_26 = arith.constant 0 : index
    %71 = vector.load %arg10[%c0_25, %c0_26] : memref<8x8xf32, #tpu.memory_space<vmem>>, vector<8x8xf32>
    tpu.vector_store %arg10[%c0_25, %c0_26], %70 {strides = array<i32>} : memref<8x8xf32, #tpu.memory_space<vmem>>, vector<8x8xf32>,
    return
  }
  func.func @transform_0(%arg0: i32) -> (i32, i32) {
    %c0_i32 = arith.constant 0 : i32
    %c0_i32_0 = arith.constant 0 : i32
    return %arg0, %c0_i32 : i32, i32
  }
  func.func @transform_1(%arg0: i32) -> (i32, i32) {
    %c0_i32 = arith.constant 0 : i32
    %c0_i32_0 = arith.constant 0 : i32
    return %arg0, %c0_i32 : i32, i32
  }
  func.func @transform_2(%arg0: i32) -> (i32, i32) {
    %c0_i32 = arith.constant 0 : i32
    %c0_i32_0 = arith.constant 0 : i32
    %c0_i32_1 = arith.constant 0 : i32
    return %c0_i32, %c0_i32_0 : i32, i32
  }
  func.func @transform_3(%arg0: i32) -> (i32, i32) {
    %c0_i32 = arith.constant 0 : i32
    %c0_i32_0 = arith.constant 0 : i32
    %c0_i32_1 = arith.constant 0 : i32
    return %c0_i32, %c0_i32_0 : i32, i32
  }
  func.func @transform_4(%arg0: i32) -> (i32, i32) {
    %c0_i32 = arith.constant 0 : i32
    %c0_i32_0 = arith.constant 0 : i32
    %c0_i32_1 = arith.constant 0 : i32
    return %c0_i32, %c0_i32_0 : i32, i32
  }
  func.func @transform_5(%arg0: i32) -> (i32, i32) {
    %c0_i32 = arith.constant 0 : i32
    %c0_i32_0 = arith.constant 0 : i32
    %c0_i32_1 = arith.constant 0 : i32
    return %c0_i32, %c0_i32_0 : i32, i32
  }
  func.func @transform_6(%arg0: i32) -> (i32, i32) {
    %c0_i32 = arith.constant 0 : i32
    %c0_i32_0 = arith.constant 0 : i32
    %c0_i32_1 = arith.constant 0 : i32
    return %c0_i32, %c0_i32_0 : i32, i32
  }
  func.func @transform_7(%arg0: i32) -> (i32, i32) {
    %c0_i32 = arith.constant 0 : i32
    %c0_i32_0 = arith.constant 0 : i32
    %c0_i32_1 = arith.constant 0 : i32
    return %c0_i32, %c0_i32_0 : i32, i32
  }
  func.func @transform_8(%arg0: i32) -> (i32, i32) {
    %c0_i32 = arith.constant 0 : i32
    %c0_i32_0 = arith.constant 0 : i32
    %c0_i32_1 = arith.constant 0 : i32
    return %c0_i32, %c0_i32_0 : i32, i32
  }
  func.func @transform_9(%arg0: i32) -> (i32, i32) {
    %c0_i32 = arith.constant 0 : i32
    %c0_i32_0 = arith.constant 0 : i32
    return %arg0, %c0_i32 : i32, i32
  }
}

</mosaic_0001>

<bundles_post_ra>
// kernel: kronenet_forward.1
= control target key start
LH: loop header
LB: loop body
LE: loop exit
PB: predicated region body
PF: predicated region fallthrough
CT: control target
= control target key end

     0   :  { %v332_v0 = vmov 0   ;;  %v333_v3 = vmov 1   ;;  %v334_v4 = vmov 0.0   ;;  %vm335_vm0 = vmmov 0   ;;  %s433_s0 = inlined_call_operand.vmem [shape: f32[8,2], index: 0, kind: input, shape index: {}]   ;;  %s434_s1 = inlined_call_operand.vmem [shape: f32[8,2], index: 1, kind: input, shape index: {}]   ;;  %s435_s5 = inlined_call_operand.vmem [shape: f32[24,24], index: 5, kind: input, shape index: {}]   ;;  %s436_s2 = inlined_call_operand.vmem [shape: f32[2,24], index: 2, kind: input, shape index: {}]   ;;  %s437_s3 = inlined_call_operand.vmem [shape: f32[2,24], index: 3, kind: input, shape index: {}]   ;;  %s438_s4 = inlined_call_operand.vmem [shape: f32[1,24], index: 4, kind: input, shape index: {}]   ;;  %s439_s7 = inlined_call_operand.vmem [shape: f32[24,8], index: 7, kind: input, shape index: {}]   ;;  %s440_s6 = inlined_call_operand.vmem [shape: f32[1,24], index: 6, kind: input, shape index: {}]   ;;  %s441_s8 = inlined_call_operand.vmem [shape: f32[1,8], index: 8, kind: input, shape index: {}]   ;;  %s442_s9 = inlined_call_operand.vmem [shape: f32[8,8], index: 9, kind: output, shape index: {}]  }
   0x1   :  { %322 = vset.pattern.permute.xlu0 %v332_v0  ;;  %v32_v1 = vld [vmem:[%s433_s0] sm:$0xff]  ;;  %324 = vset.pattern.permute.xlu1 %v332_v0  ;;  %v88_v5 = vld [vmem:[%s435_s5 + $0x10] sm:$0xff]  ;;  %v87_v6 = vld [vmem:[%s435_s5 + $0x8] sm:$0xff]  ;;  %v41_v8 = vlaneseq  ;;  %vm96_vm1 = vcmask 195584   ;;  %vm266_vm5 = vcmask 64512  }
   0x2   :  { %v33_v2 = vld [vmem:[%s434_s1] sm:$0xff]  ;;  %38 = vperm.xlu0 %322, %v32_v1   ;;  %300 = vmatprep.subr.mxu0 %v334_v4  ;;  %v173_v32 = vld [vmem:[%s439_s7 + $0x10] sm:$0xff]  ;;  %v172_v33 = vld [vmem:[%s439_s7 + $0x8] sm:$0xff] }
   0x3   :  { %58 = vperm.xlu1 %324, %v33_v2   ;;  %309 = vmatprep.subr.mxu1 %v334_v4  ;;  %v86_v7 = vld [vmem:[%s435_s5] sm:$0xff]  ;;  %v42_v9 = vshrl.u32 %v41_v8, 7  ;;  %v261_v44 = vand.u32 127, %v41_v8 }
   0x4   :  { %301 = vmatpush3.msra.mxu0 %v88_v5  ;;  %306 = vmatprep.mubr.msk.f32.mxu0 %vm335_vm0, %v334_v4  ;;  %v34_v12 = vld [vmem:[%s436_s2] sm:$0x3] }
   0x5   :  { %302 = vmatprep.subr.mxu0 %v334_v4  ;;  %315 = vmatprep.mubr.msk.f32.mxu1 %vm335_vm0, %v334_v4  ;;  %v43_v10 = vsub.s32 0, %v42_v9  ;;  %v52_v11 = vsub.s32 1, %v42_v9  ;;  %v35_v15 = vld [vmem:[%s437_s3] sm:$0x3]  ;;  %vm262_vm2 = vcmp.ge.s32.totalorder %v261_v44, 1  ;;  %vm263_vm3 = vcmp.lt.s32.totalorder %v261_v44, 4 }
   0x6   :  { %323 = vset.pattern.permute.xlu0 %v333_v3  ;;  %303 = vmatpush3.msra.mxu0 %v87_v6  ;;  %v287_v28 = vld [vmem:[%s438_s4] ss:$0 sm:$0xff]  ;;  %vm264_vm4 = vmand %vm262_vm2, %vm263_vm3 }
   0x7   :  { %325 = vset.pattern.permute.xlu1 %v333_v3  ;;  %47 = vperm.xlu0 %323, %v32_v1   ;;  %v44_v16 = vrot.slane %v34_v12, %v43_v10  ;;  %v53_v17 = vrot.slane %v34_v12, %v52_v11  ;;  %v64_v18 = vrot.slane %v35_v15, %v43_v10  ;;  %v171_v34 = vld [vmem:[%s439_s7] sm:$0xff] }
   0x8   :  { %68 = vperm.xlu1 %325, %v33_v2   ;;  %304 = vmatprep.subr.mxu0 %v334_v4  ;;  %v74_v19 = vrot.slane %v35_v15, %v52_v11  ;;  %v288_v35 = vld [vmem:[%s440_s6] ss:$0 sm:$0xff] }
   0x9   :  { %305 = vmatpush3.msra.mxu0 %v86_v7  ;;  %310 = vmatpush3.msra.mxu1 %v173_v32  ;;  %v290_v40 = vld [vmem:[%s441_s8] ss:$0 sm:$0xff] }
   0xa   :  { %311 = vmatprep.subr.mxu1 %v334_v4 }
   0xb   :  { %327 = vset.pattern.permute.xlu0 %v332_v0  ;;  %312 = vmatpush3.msra.mxu1 %v172_v33 }
   0xc   :  { %326 = vset.pattern.permute.xlu1 %v332_v0  ;;  %313 = vmatprep.subr.mxu1 %v334_v4 }
   0xd   :  { %314 = vmatpush3.msra.mxu1 %v171_v34 }
  0x7d   :  { %v39_v13 = vpop.permute.xlu0 %38 }
  0x7e   :  { %v59_v14 = vpop.permute.xlu1 %58  ;;  %v45_v22 = vmul.f32 %v44_v16, %v39_v13 }
  0x7f   :  { %v65_v24 = vmul.f32 %v64_v18, %v59_v14 }
  0x82   :  { %v48_v20 = vpop.permute.xlu0 %47 }
  0x83   :  { %v69_v21 = vpop.permute.xlu1 %68  ;;  %v54_v23 = vmul.f32 %v53_v17, %v48_v20 }
  0x84   :  { %v75_v26 = vmul.f32 %v74_v19, %v69_v21 }
  0x85   :  { %v55_v25 = vadd.f32 %v54_v23, %v45_v22 }
  0x87   :  { %v66_v27 = vadd.f32 %v65_v24, %v55_v25 }
  0x89   :  { %v76_v29 = vadd.f32 %v75_v26, %v66_v27 }
  0x8b   :  { %v84_v30 = vadd.f32 %v287_v28, %v76_v29 }
  0x8d   :  { %v85_v31 = vmax.f32 %v84_v30, 0.0 }
  0x8f   :  { %307 = vmatmul.mubr.msk.f32.vlgmr.msra.gmra.mxu0 %vm96_vm1, %v85_v31 }
 0x14f   :  { %v166_v36 = vpop.f32.mrf.mxu0 }
 0x150   :  { %v167_v37 = vadd.f32 %v288_v35, %v166_v36 }
 0x151   :  { %v308_v38 = vpop.f32.mrf.mxu0 }
 0x152   :  { %v170_v39 = vmax.f32 %v167_v37, 0.0 }
 0x154   :  { %316 = vmatmul.mubr.msk.f32.vlgmr.msra.gmra.mxu1 %vm96_vm1, %v170_v39 }
 0x214   :  { %v250_v41 = vpop.f32.mrf.mxu1 }
 0x215   :  { %v251_v42 = vadd.f32 %v290_v40, %v250_v41 }
 0x216   :  { %v317_v43 = vpop.f32.mrf.mxu1 }
 0x217   :  { %256 = vperm.xlu1 %326, %v251_v42  }
 0x292   :  { %v257_v45 = vpop.permute.xlu1 %256 }
 0x293   :  { %v259_v46 = vmul.f32 %v257_v45, %v251_v42 }
 0x295   :  { %v265_v47 = vsel %vm264_vm4, %v259_v46, -1e+30 }
 0x296   :  { %v267_v48 = vsel %vm266_vm5, %v265_v47, -inf }
 0x297   :  { %268 = vmax.xlane.f32.xlu0 %v267_v48 }
 0x320   :  { %v269_v49 = vpop.xlane.xlu0 %268 }
 0x321   :  { %v270_v50 = vsub.f32 %v265_v47, %v269_v49 }
 0x323   :  { %v271_v51 = vmul.f32 1.442695, %v270_v50 }
 0x325   :  { %328 = vpow2.f32 %v271_v51 }
 0x332   :  { %v329_v52 = vpop.eup %328 }
 0x333   :  { %v273_v53 = vsel %vm264_vm4, %v329_v52, 0.0 }
 0x334   :  { %v274_v54 = vsel %vm266_vm5, %v273_v53, 0.0 }
 0x335   :  { %275 = vadd.xlane.f32.xlu1 %v274_v54 }
 0x3be   :  { %v276_v55 = vpop.xlane.xlu1 %275 }
 0x3bf   :  { %330 = vrcp.f32 %v276_v55 }
 0x3cc   :  { %v331_v56 = vpop.eup %330 }
 0x3cd   :  { %v278_v57 = vmul.f32 %v331_v56, %v276_v55 }
 0x3cf   :  { %v279_v58 = vsub.f32 2.0, %v278_v57 }
 0x3d1   :  { %v280_v59 = vmul.f32 %v331_v56, %v279_v58 }
 0x3d3   :  { %v281_v60 = vmul.f32 %v280_v59, %v273_v53 }
 0x3d5   :  { %282 = vst.msk [vmem:[%s442_s9] sm:$0xff] %vm266_vm5, %v281_v60 }

</bundles_post_ra>
